<compile_context>
chip_gen: v6e
topology: v6e:2x2x1
jax: 0.10.0
libtpu: 0.0.40
codegen_flags: <defaults>
</compile_context>

<pallas_src>
import math
import functools

import jax
import jax.numpy as jnp
from jax.experimental import pallas as pl
from jax.experimental.pallas import tpu as pltpu


def make_sinusoidal_pe(block_size, n_embd, dtype=jnp.float32):
    """Build the fixed sinusoidal table, identical to the PyTorch buffer."""
    position = jnp.arange(block_size, dtype=jnp.float32)[:, None]          # (S, 1)
    div_term = jnp.exp(jnp.arange(0.0, n_embd, 2.0, dtype=jnp.float32)
                       * -(math.log(10000.0) / n_embd))                    # (E/2,)
    pe = jnp.zeros((block_size, n_embd), dtype=jnp.float32)
    pe = pe.at[:, 0::2].set(jnp.sin(position * div_term))
    pe = pe.at[:, 1::2].set(jnp.cos(position * div_term))
    return pe.astype(dtype)


# ---------------------------------------------------------------------------
# Kernels (elementwise over lane-dense (rows, cols) blocks)
# ---------------------------------------------------------------------------

def _add_pe_kernel(x_ref, pe_ref, out_ref):
    # x_ref : (Bb, bn), pe_ref : (1, bn) -> sublane broadcast of the pe row.
    out_ref[...] = (x_ref[...] + pe_ref[...]).astype(out_ref.dtype)


def _add_pe_dropout_kernel(x_ref, pe_ref, bits_ref, out_ref, *, threshold, scale):
    # bits_ref holds uniform int32 values in [0, 2^24); keep iff bits >= p*2^24
    # (integer threshold compare: no int->float convert, no 1/2^24 multiply).
    y = x_ref[...] + pe_ref[...]
    keep = bits_ref[...] >= threshold
    out_ref[...] = jnp.where(keep, y * scale, 0.0).astype(out_ref.dtype)


# ---------------------------------------------------------------------------
# Tiling helpers
# ---------------------------------------------------------------------------

def _pick_batch_tile(B):
    """Second-to-last block dim: full B if small, else a multiple of 8."""
    if B <= 8:
        return B
    if B % 8 == 0:
        return 8
    return B  # full-dim block (always legal)


def _pick_block_n(Np, cap_elems):
    """Largest multiple of 128 that divides Np and fits the VMEM budget."""
    if Np <= cap_elems:
        return Np
    best = 128
    for d in range(1, Np // 128 + 1):
        bn = d * 128
        if Np % bn == 0 and bn <= cap_elems:
            best = bn
    return best


# ---------------------------------------------------------------------------
# Wrapper
# ---------------------------------------------------------------------------

def position_embedding(x, pe, *, dropout_p=0.0, train=False, rng_key=None):
    """x: (B, T, E); pe: (block_size, E) sinusoidal table. Returns dropout(x + pe[:T])."""
    B, T, E = x.shape
    assert pe.shape[1] == E and pe.shape[0] >= T

    use_dropout = bool(train) and float(dropout_p) > 0.0
    if use_dropout and float(dropout_p) >= 1.0:
        return jnp.zeros_like(x)

    # --- flatten to a lane-dense 2D layout (pure layout plumbing) -----------
    N = T * E
    x_flat = x.reshape(B, N)
    pe_flat = pe[:T].astype(x.dtype).reshape(1, N)

    Np = ((N + 127) // 128) * 128          # pad cols to a multiple of 128
    if Np != N:
        x_flat = jnp.pad(x_flat, ((0, 0), (0, Np - N)))
        pe_flat = jnp.pad(pe_flat, ((0, 0), (0, Np - N)))

    # --- VMEM-budget-derived block sizes -------------------------------------
    Bb = _pick_batch_tile(B)
    num_b = B // Bb
    itemsize = jnp.dtype(x.dtype).itemsize
    # double-buffered bytes per column of block: x + out (+ int32 bits) per
    # batch row, plus one pe row.
    per_col_bytes = 2 * (Bb * (2 * itemsize + (4 if use_dropout else 0)) + itemsize)
    budget_bytes = 8 * 1024 * 1024
    cap = max(128, (budget_bytes // per_col_bytes) // 128 * 128)
    bn = _pick_block_n(Np, cap)
    num_n = Np // bn

    # grid = (col tiles, batch tiles); batch innermost so the pe block index
    # stays constant across consecutive steps (Pallas skips the re-DMA).
    grid = (num_n, num_b)
    row_spec = pl.BlockSpec((Bb, bn), lambda n, b: (b, n))
    pe_spec = pl.BlockSpec((1, bn), lambda n, b: (0, n))

    compiler_params = pltpu.CompilerParams(
        dimension_semantics=("parallel", "arbitrary"),
        vmem_limit_bytes=32 * 1024 * 1024,
    )

    if use_dropout:
        p = float(dropout_p)
        threshold = int(round(p * (1 << 24)))
        scale = 1.0 / (1.0 - p)
        if rng_key is None:
            rng_key = jax.random.PRNGKey(0)
        bits = jax.random.randint(rng_key, (B, Np), 0, 1 << 24, dtype=jnp.int32)
        kernel = functools.partial(_add_pe_dropout_kernel,
                                   threshold=threshold, scale=scale)
        in_specs = [row_spec, pe_spec, pl.BlockSpec((Bb, bn), lambda n, b: (b, n))]
        args = (x_flat, pe_flat, bits)
    else:
        kernel = _add_pe_kernel
        in_specs = [row_spec, pe_spec]
        args = (x_flat, pe_flat)

    out_flat = pl.pallas_call(
        kernel,
        out_shape=jax.ShapeDtypeStruct((B, Np), x.dtype),
        grid=grid,
        in_specs=in_specs,
        out_specs=row_spec,
        compiler_params=compiler_params,
    )(*args)

    if Np != N:
        out_flat = out_flat[:, :N]
    return out_flat.reshape(B, T, E)


# ---------------------------------------------------------------------------
# Self-test
# ---------------------------------------------------------------------------

if __name__ == "__main__":
    # Config implied by the module: n_embd, block_size, dropout.
    n_embd = 32
    block_size = 16
    dropout = 0.1
    B, T = 2, 8

    key = jax.random.PRNGKey(0)
    kx, kd = jax.random.split(key)
    x = jax.random.normal(kx, (B, T, n_embd), dtype=jnp.float32)
    pe = make_sinusoidal_pe(block_size, n_embd)

    # Eval-mode forward (dropout is identity): must match x + pe[:T] exactly.
    out = position_embedding(x, pe, dropout_p=dropout, train=False)
    out = jax.block_until_ready(out)

    ref = x + pe[:T][None, :, :]
    assert out.shape == (B, T, n_embd)
    assert out.dtype == jnp.float32
    assert jnp.allclose(out, ref, atol=1e-5, rtol=1e-5)

    # Training-mode forward: kept entries are exactly (x + pe) / (1 - p),
    # dropped entries are exactly 0.
    p_train = 0.5
    out_tr = position_embedding(x, pe, dropout_p=p_train, train=True, rng_key=kd)
    out_tr = jax.block_until_ready(out_tr)
    nz = out_tr != 0.0
    assert jnp.allclose(jnp.where(nz, out_tr, 0.0),
                        jnp.where(nz, ref / (1.0 - p_train), 0.0),
                        atol=1e-5, rtol=1e-5)

    print("KERNEL_OK")
</pallas_src>

<mosaic_0001>
module attributes {stable_mosaic.version = 11 : i64} {
  func.func @_add_pe_kernel(%arg0: i32, %arg1: i32, %arg2: memref<2x256xf32, #tpu.memory_space<vmem>>, %arg3: memref<1x256xf32, #tpu.memory_space<vmem>>, %arg4: memref<2x256xf32, #tpu.memory_space<vmem>>) attributes {dimension_semantics = [#tpu.dimension_semantics<parallel>, #tpu.dimension_semantics<arbitrary>], iteration_bounds = array<i64: 1, 1>, scalar_prefetch = 0 : i64, scratch_operands = 0 : i64, tpu.core_type = #tpu.core_type<tc>, window_params = [{transform_indices = @transform_0, window_bounds = array<i64: 2, 256>}, {transform_indices = @transform_1, window_bounds = array<i64: 1, 256>}, {transform_indices = @transform_2, window_bounds = array<i64: 2, 256>}]} {
    %c0 = arith.constant 0 : index
    %c0_0 = arith.constant 0 : index
    %0 = vector.load %arg2[%c0, %c0_0] : memref<2x256xf32, #tpu.memory_space<vmem>>, vector<2x256xf32>
    %c0_1 = arith.constant 0 : index
    %c0_2 = arith.constant 0 : index
    %1 = vector.load %arg3[%c0_1, %c0_2] : memref<1x256xf32, #tpu.memory_space<vmem>>, vector<1x256xf32>
    %2 = vector.broadcast %1 : vector<1x256xf32> to vector<2x256xf32>
    %3 = arith.addf %0, %2 : vector<2x256xf32>
    %c0_3 = arith.constant 0 : index
    %c0_4 = arith.constant 0 : index
    %4 = vector.load %arg4[%c0_3, %c0_4] : memref<2x256xf32, #tpu.memory_space<vmem>>, vector<2x256xf32>
    tpu.vector_store %arg4[%c0_3, %c0_4], %3 {strides = array<i32>} : memref<2x256xf32, #tpu.memory_space<vmem>>, vector<2x256xf32>,
    return
  }
  func.func @transform_0(%arg0: i32, %arg1: i32) -> (i32, i32) {
    %c0_i32 = arith.constant 0 : i32
    return %arg1, %arg0 : i32, i32
  }
  func.func @transform_1(%arg0: i32, %arg1: i32) -> (i32, i32) {
    %c0_i32 = arith.constant 0 : i32
    %c0_i32_0 = arith.constant 0 : i32
    return %c0_i32, %arg0 : i32, i32
  }
  func.func @transform_2(%arg0: i32, %arg1: i32) -> (i32, i32) {
    %c0_i32 = arith.constant 0 : i32
    return %arg1, %arg0 : i32, i32
  }
}

</mosaic_0001>

<bundles_post_ra>
// kernel: tpu_custom_call.1
= control target key start
LH: loop header
LB: loop body
LE: loop exit
PB: predicated region body
PF: predicated region fallthrough
CT: control target
= control target key end

     0   :  { %7 = vsyncpa [#allocation3], 0  ;;  %s172_s0 = inlined_call_operand.hbm [shape: f32[2,256], index: 0, kind: input, shape index: {}]   ;;  %s173_s1 = inlined_call_operand.hbm [shape: f32[1,256], index: 1, kind: input, shape index: {}]   ;;  %s174_s2 = inlined_call_operand.hbm [shape: f32[2,256], index: 2, kind: output, shape index: {}]  }
   0x1   :  { %8 = vsyncpa [#allocation6], 0 }
   0x2   :  { %9 = vsyncpa [#allocation4], 0  ;;  %s144_s9 = smov [#allocation2]   ;;  %s145_s11 = smov [#allocation5]  }
   0x3   :  { %s16_s10 = sshll.u32 %s144_s9, 4  ;;  %s26_s12 = sshll.u32 %s145_s11, 4  ;;  %s17_s10 = int_to_ptr.vmem [resolvable:$true] %s16_s10  ;;  %s27_s12 = int_to_ptr.vmem [resolvable:$true] %s26_s12 }
   0x4   :  { %s86_s13 = scalar_lea.vmem %s17_s10, 64  ;;  %p91_p1 = scmp.lt.s32.totalorder %s17_s10, %s17_s10 }
   0x5   :  { %p87_p0 = scmp.ne.s32.totalorder %s17_s10, %s86_s13  ;;  %p92_p2 = scmp.lt.s32.totalorder %s86_s13, %s86_s13 }
   0x7   :  { %p93_p3 = por %p92_p2, %p91_p1 }
   0x9   :  { %p94_p4 = pnand %p93_p3, %p87_p0 }
   0xb   :  { %97 = shalt.err (!%p94_p4)
}
   0xc   :  { %19 = dma.hbm_to_vmem [thread:$0]  %s172_s0, 64, %s17_s10, [#allocation3]  }
   0xd   :  { %s106_s16 = scalar_lea.vmem %s27_s12, 32  ;;  %p111_p6 = scmp.lt.s32.totalorder %s27_s12, %s27_s12 }
   0xe   :  { %p107_p5 = scmp.ne.s32.totalorder %s27_s12, %s106_s16  ;;  %p112_p7 = scmp.lt.s32.totalorder %s106_s16, %s106_s16 }
  0x10   :  { %p113_p8 = por %p112_p7, %p111_p6 }
  0x12   :  { %p114_p9 = pnand %p113_p8, %p107_p5 }
  0x14   :  { %117 = shalt.err (!%p114_p9)
}
  0x15   :  { %29 = dma.hbm_to_vmem [thread:$0]  %s173_s1, 32, %s27_s12, [#allocation6]  }
  0x16   :  { %138 = dma.done.wait [#allocation3], 64  }
  0x17   :  { %139 = vsyncadd [#allocation3], 4294967232 }
  0x18   :  { %140 = dma.done.wait [#allocation6], 32  }
  0x19   :  { %141 = vsyncadd [#allocation6], 4294967264  ;;  %v39_v0 = vlaneseq  ;;  %v146_v1 = vmov 1983009808   ;;  %v37_v7 = vld [vmem:[#allocation5] sm:$0x3] }
  0x1a   :  { %v49_v2 = vunpack.c.l.s4 %v146_v1  ;;  %v36_v12 = vld [vmem:[#allocation2] sm:$0xf]  ;;  %s147_s0 = smov [#allocation7]  }
  0x1b   :  { %v40_v3 = vshrl.u32 %v39_v0, 7  ;;  %s64_s19 = sshll.u32 %s147_s0, 4  ;;  %s65_s19 = int_to_ptr.vmem [resolvable:$true] %s64_s19 }
  0x1c   :  { %v50_v6 = vunpack.c.0.s8 %v49_v2  ;;  %s118_s1 = scalar_lea.vmem %s65_s19, 64  ;;  %p123_p11 = scmp.lt.s32.totalorder %s65_s19, %s65_s19 }
  0x1d   :  { %v41_v4 = vsub.s32 0, %v40_v3  ;;  %v45_v5 = vsub.s32 1, %v40_v3  ;;  %p119_p10 = scmp.ne.s32.totalorder %s65_s19, %s118_s1  ;;  %p124_p12 = scmp.lt.s32.totalorder %s118_s1, %s118_s1 }
  0x1e   :  { %v53_v10 = vsub.s32 %v50_v6, %v40_v3 }
  0x1f   :  { %v42_v8 = vrot.slane %v37_v7, %v41_v4  ;;  %v46_v9 = vrot.slane %v37_v7, %v45_v5  ;;  %p125_p13 = por %p124_p12, %p123_p11 }
  0x21   :  { %v47_v11 = vcombine.low %v42_v8, %v46_v9  ;;  %p126_p0 = pnand %p125_p13, %p119_p10 }
  0x23   :  { %v54_v13 = vrot.slane %v47_v11, %v53_v10 }
  0x25   :  { %v56_v14 = vadd.f32 %v54_v13, %v36_v12 }
  0x27   :  { %57 = vst [vmem:[#allocation7] sm:$0xf] %v56_v14 }
  0x28   :  { %129 = shalt.err (!%p126_p0)
}
  0x29   :  { %67 = dma.vmem_to_hbm [thread:$0]  %s65_s19, 64, %s174_s2, [#allocation4]  }
  0x2a   :  { %142 = dma.done.wait [#allocation4], 64  }
  0x2b   :  { %143 = vsyncadd [#allocation4], 4294967232 }
  0x2c   :  { %71 = vsyncpa [#allocation3], 1 }
  0x2d   :  { %72 = vsyncpa [#allocation6], 1 }
  0x2e   :  { %73 = vsyncpa [#allocation4], 1 }

</bundles_post_ra>
